<compile_context>
chip_gen: v5e
topology: v5e:2x2
jax: 0.10.0
libtpu: 0.0.40
codegen_flags: <defaults>
</compile_context>

<pallas_src>
import math

import jax
import jax.numpy as jnp
from jax.experimental import pallas as pl
from jax.experimental.pallas import tpu as pltpu


_INV_SQRT2 = 1.0 / math.sqrt(2.0)


def _mlp_kernel(x_ref, w1_ref, b1_ref, w2_ref, b2_ref, o_ref, acc_ref):
    """One (row-tile, hidden-tile) step of fc1 -> GELU -> fc2.

    Grid = (num_row_tiles, num_hidden_tiles). The hidden axis is a reduction
    accumulated into an f32 VMEM scratch; init at k == 0, finalize (add fc2
    bias, cast, store) at the last k.
    """
    k = pl.program_id(1)

    @pl.when(k == 0)
    def _():
        acc_ref[...] = jnp.zeros_like(acc_ref)

    # fc1 partial: (tm, C_in) @ (C_in, th), f32 accumulation on the MXU.
    h = jnp.dot(x_ref[...], w1_ref[...], preferred_element_type=jnp.float32)
    h = h + b1_ref[...].astype(jnp.float32)

    # Exact (erf) GELU in f32 — matches torch.nn.GELU default.
    # (GELU is elementwise over the hidden dim, so hidden tiling is exact.)
    h = 0.5 * h * (1.0 + jax.lax.erf(h * jnp.float32(_INV_SQRT2)))

    # dropout(p=0.0) is the identity — nothing to do.

    # fc2 partial contribution: (tm, th) @ (th, C_out_p). Cast h down to the
    # weight dtype so the bf16 MXU fast path is used when weights are bf16.
    acc_ref[...] += jnp.dot(h.astype(w2_ref.dtype), w2_ref[...],
                            preferred_element_type=jnp.float32)

    @pl.when(k == pl.num_programs(1) - 1)
    def _():
        o_ref[...] = (acc_ref[...] + b2_ref[...].astype(jnp.float32)
                      ).astype(o_ref.dtype)


def _round_up(a: int, b: int) -> int:
    return ((a + b - 1) // b) * b


def mlp_pallas(x, w1, b1, w2, b2, *, tile_m=256, tile_h=512,
               compute_dtype=None, vmem_limit_bytes=48 * 1024 * 1024):
    """Mlp forward: fc1 -> GELU -> dropout(0) -> fc2 -> dropout(0).

    x:  (B, N, C_in)
    w1: (C_in, H),   b1: (H,)      (transpose of PyTorch (out, in) layout)
    w2: (H, C_out),  b2: (C_out,)
    compute_dtype: optional dtype (e.g. jnp.bfloat16) for x/W1/W2 matmul
        inputs; accumulation is always f32 and output keeps x's dtype.
    """
    B, N, C_in = x.shape
    H = w1.shape[1]
    C_out = w2.shape[1]
    M = B * N
    out_dtype = x.dtype

    if compute_dtype is not None:
        x = x.astype(compute_dtype)
        w1 = w1.astype(compute_dtype)
        w2 = w2.astype(compute_dtype)

    x2 = x.reshape(M, C_in)

    # --- Row (M) tiling: pad M to a multiple of the row tile. ---
    tm = min(tile_m, _round_up(M, 8))
    M_p = _round_up(M, tm)
    if M_p != M:
        x2 = jnp.pad(x2, ((0, M_p - M), (0, 0)))

    # --- Hidden (H) tiling: bounds resident weight VMEM independent of H. ---
    if H <= tile_h:
        th, H_p = H, H
    else:
        th = _round_up(tile_h, 128)
        H_p = _round_up(H, th)
    if H_p != H:
        w1 = jnp.pad(w1, ((0, 0), (0, H_p - H)))
        b1 = jnp.pad(b1, ((0, H_p - H),))
        w2 = jnp.pad(w2, ((0, H_p - H), (0, 0)))

    # --- Lane-dense output: pad C_out up to a multiple of 128. ---
    C_out_p = _round_up(C_out, 128)
    if C_out_p != C_out:
        w2 = jnp.pad(w2, ((0, 0), (0, C_out_p - C_out)))
        b2 = jnp.pad(b2, ((0, C_out_p - C_out),))

    b1_2 = b1.reshape(1, H_p).astype(jnp.float32)
    b2_2 = b2.reshape(1, C_out_p).astype(jnp.float32)

    grid = (M_p // tm, H_p // th)

    cost = pl.CostEstimate(
        flops=2 * M * (C_in * H + H * C_out),
        transcendentals=M * H,  # erf over the (M, H) intermediate
        bytes_accessed=(x2.size * x2.dtype.itemsize
                        + w1.size * w1.dtype.itemsize
                        + w2.size * w2.dtype.itemsize
                        + b1_2.size * 4 + b2_2.size * 4
                        + M_p * C_out_p * jnp.dtype(out_dtype).itemsize),
    )

    out2 = pl.pallas_call(
        _mlp_kernel,
        out_shape=jax.ShapeDtypeStruct((M_p, C_out_p), out_dtype),
        grid_spec=pltpu.PrefetchScalarGridSpec(
            num_scalar_prefetch=0,
            grid=grid,
            in_specs=[
                pl.BlockSpec((tm, C_in), lambda i, k: (i, 0)),      # x row tile
                pl.BlockSpec((C_in, th), lambda i, k: (0, k)),      # W1 hidden slab
                pl.BlockSpec((1, th), lambda i, k: (0, k)),         # b1 slab
                pl.BlockSpec((th, C_out_p), lambda i, k: (k, 0)),   # W2 hidden slab
                pl.BlockSpec((1, C_out_p), lambda i, k: (0, 0)),    # b2
            ],
            out_specs=pl.BlockSpec((tm, C_out_p), lambda i, k: (i, 0)),
            scratch_shapes=[pltpu.VMEM((tm, C_out_p), jnp.float32)],
        ),
        compiler_params=pltpu.CompilerParams(
            dimension_semantics=("parallel", "arbitrary"),
            vmem_limit_bytes=vmem_limit_bytes,
        ),
        cost_estimate=cost,
    )(x2, w1, b1_2, w2, b2_2)

    return out2[:M, :C_out].reshape(B, N, C_out)


def _init_linear(key, fan_in, fan_out):
    """Deterministic init mimicking torch.nn.Linear (uniform +/- 1/sqrt(fan_in)).
    Returns weight in (in, out) layout + bias."""
    kw, kb = jax.random.split(key)
    bound = 1.0 / math.sqrt(fan_in)
    w = jax.random.uniform(kw, (fan_in, fan_out), jnp.float32, -bound, bound)
    b = jax.random.uniform(kb, (fan_out,), jnp.float32, -bound, bound)
    return w, b


def _mlp_ref(x, w1, b1, w2, b2):
    h = jnp.einsum("bnc,ch->bnh", x, w1) + b1
    h = 0.5 * h * (1.0 + jax.lax.erf(h / jnp.sqrt(2.0)))
    return jnp.einsum("bnh,ho->bno", h, w2) + b2


if __name__ == "__main__":
    # Small shapes consistent with the module: batch=2, seq=8,
    # in_features=32, hidden_features=64, out_features=32 (defaults to in).
    B, N, C_in, Hid, C_out = 2, 8, 32, 64, 32

    key = jax.random.PRNGKey(0)
    kx, k1, k2 = jax.random.split(key, 3)

    x = jax.random.normal(kx, (B, N, C_in), dtype=jnp.float32)
    w1, b1 = _init_linear(k1, C_in, Hid)
    w2, b2 = _init_linear(k2, Hid, C_out)

    ref = _mlp_ref(x, w1, b1, w2, b2)

    # f32 path: strict check against the erf-GELU reference.
    out = mlp_pallas(x, w1, b1, w2, b2)
    out = jax.block_until_ready(out)
    assert out.shape == (B, N, C_out)
    assert jnp.allclose(out, ref, atol=1e-5, rtol=1e-5), "f32 mismatch vs reference"

    # bf16-input / f32-accumulation fast path: loose check.
    out_bf16 = mlp_pallas(x, w1, b1, w2, b2, compute_dtype=jnp.bfloat16)
    out_bf16 = jax.block_until_ready(out_bf16)
    assert jnp.allclose(out_bf16, ref, atol=5e-2, rtol=5e-2), "bf16 mismatch vs reference"

    print("KERNEL_OK")
</pallas_src>

<mosaic_0001>
module attributes {stable_mosaic.version = 11 : i64} {
  func.func @_mlp_kernel(%arg0: i32, %arg1: i32, %arg2: memref<16x32xf32, #tpu.memory_space<vmem>>, %arg3: memref<32x64xf32, #tpu.memory_space<vmem>>, %arg4: memref<1x64xf32, #tpu.memory_space<vmem>>, %arg5: memref<64x128xf32, #tpu.memory_space<vmem>>, %arg6: memref<1x128xf32, #tpu.memory_space<vmem>>, %arg7: memref<16x128xf32, #tpu.memory_space<vmem>>, %arg8: memref<16x128xf32, #tpu.memory_space<vmem>>) attributes {dimension_semantics = [#tpu.dimension_semantics<parallel>, #tpu.dimension_semantics<arbitrary>], iteration_bounds = array<i64: 1, 1>, scalar_prefetch = 0 : i64, scratch_operands = 1 : i64, tpu.core_type = #tpu.core_type<tc>, window_params = [{transform_indices = @transform_0, window_bounds = array<i64: 16, 32>}, {transform_indices = @transform_1, window_bounds = array<i64: 32, 64>}, {transform_indices = @transform_2, window_bounds = array<i64: 1, 64>}, {transform_indices = @transform_3, window_bounds = array<i64: 64, 128>}, {pipeline_mode = #tpu.pipeline_mode<synchronous>, transform_indices = @transform_4, window_bounds = array<i64: 1, 128>}, {transform_indices = @transform_5, window_bounds = array<i64: 16, 128>}]} {
    %c0_i32 = arith.constant 0 : i32
    %0 = arith.cmpi eq, %arg1, %c0_i32 : i32
    %1 = arith.extui %0 : i1 to i32
    %c0_i32_0 = arith.constant 0 : i32
    %2 = arith.cmpi ne, %1, %c0_i32_0 : i32
    scf.if %2 {
      %cst_18 = arith.constant 0.000000e+00 : f32
      %25 = vector.broadcast %cst_18 : f32 to vector<16x128xf32>
      %c0_19 = arith.constant 0 : index
      %c0_20 = arith.constant 0 : index
      %26 = vector.load %arg8[%c0_19, %c0_20] : memref<16x128xf32, #tpu.memory_space<vmem>>, vector<16x128xf32>
      tpu.vector_store %arg8[%c0_19, %c0_20], %25 {strides = array<i32>} : memref<16x128xf32, #tpu.memory_space<vmem>>, vector<16x128xf32>,
    } else {
    }
    %c0 = arith.constant 0 : index
    %c0_1 = arith.constant 0 : index
    %3 = vector.load %arg2[%c0, %c0_1] : memref<16x32xf32, #tpu.memory_space<vmem>>, vector<16x32xf32>
    %c0_2 = arith.constant 0 : index
    %c0_3 = arith.constant 0 : index
    %4 = vector.load %arg3[%c0_2, %c0_3] : memref<32x64xf32, #tpu.memory_space<vmem>>, vector<32x64xf32>
    %cst = arith.constant dense<0.000000e+00> : vector<16x64xf32>
    %5 = tpu.matmul %3, %4, %cst {dimension_numbers = #tpu.dot_dimension_numbers<[1], [0], [0], [1], [0, 0, 1, 1], [], []>} : vector<16x32xf32>, vector<32x64xf32>, vector<16x64xf32> -> vector<16x64xf32>
    %c0_4 = arith.constant 0 : index
    %c0_5 = arith.constant 0 : index
    %6 = vector.load %arg4[%c0_4, %c0_5] : memref<1x64xf32, #tpu.memory_space<vmem>>, vector<1x64xf32>
    %7 = vector.broadcast %6 : vector<1x64xf32> to vector<16x64xf32>
    %8 = arith.addf %5, %7 : vector<16x64xf32>
    %cst_6 = arith.constant 5.000000e-01 : f32
    %9 = vector.broadcast %cst_6 : f32 to vector<16x64xf32>
    %10 = arith.mulf %9, %8 : vector<16x64xf32>
    %cst_7 = arith.constant 0.707106769 : f32
    %11 = vector.broadcast %cst_7 : f32 to vector<16x64xf32>
    %12 = arith.mulf %8, %11 : vector<16x64xf32>
    %13 = math.erf %12 : vector<16x64xf32>
    %cst_8 = arith.constant 1.000000e+00 : f32
    %14 = vector.broadcast %cst_8 : f32 to vector<16x64xf32>
    %15 = arith.addf %14, %13 : vector<16x64xf32>
    %16 = arith.mulf %10, %15 : vector<16x64xf32>
    %c0_9 = arith.constant 0 : index
    %c0_10 = arith.constant 0 : index
    %17 = vector.load %arg8[%c0_9, %c0_10] : memref<16x128xf32, #tpu.memory_space<vmem>>, vector<16x128xf32>
    %c0_11 = arith.constant 0 : index
    %c0_12 = arith.constant 0 : index
    %18 = vector.load %arg5[%c0_11, %c0_12] : memref<64x128xf32, #tpu.memory_space<vmem>>, vector<64x128xf32>
    %cst_13 = arith.constant dense<0.000000e+00> : vector<16x128xf32>
    %19 = tpu.matmul %16, %18, %cst_13 {dimension_numbers = #tpu.dot_dimension_numbers<[1], [0], [0], [1], [0, 0, 1, 1], [], []>} : vector<16x64xf32>, vector<64x128xf32>, vector<16x128xf32> -> vector<16x128xf32>
    %20 = arith.addf %17, %19 : vector<16x128xf32>
    %c0_14 = arith.constant 0 : index
    %c0_15 = arith.constant 0 : index
    %21 = vector.load %arg8[%c0_14, %c0_15] : memref<16x128xf32, #tpu.memory_space<vmem>>, vector<16x128xf32>
    tpu.vector_store %arg8[%c0_14, %c0_15], %20 {strides = array<i32>} : memref<16x128xf32, #tpu.memory_space<vmem>>, vector<16x128xf32>,
    %c0_i32_16 = arith.constant 0 : i32
    %22 = arith.cmpi eq, %arg1, %c0_i32_16 : i32
    %23 = arith.extui %22 : i1 to i32
    %c0_i32_17 = arith.constant 0 : i32
    %24 = arith.cmpi ne, %23, %c0_i32_17 : i32
    scf.if %24 {
      %c0_18 = arith.constant 0 : index
      %c0_19 = arith.constant 0 : index
      %25 = vector.load %arg8[%c0_18, %c0_19] : memref<16x128xf32, #tpu.memory_space<vmem>>, vector<16x128xf32>
      %c0_20 = arith.constant 0 : index
      %c0_21 = arith.constant 0 : index
      %26 = vector.load %arg6[%c0_20, %c0_21] : memref<1x128xf32, #tpu.memory_space<vmem>>, vector<1x128xf32>
      %27 = vector.broadcast %26 : vector<1x128xf32> to vector<16x128xf32>
      %28 = arith.addf %25, %27 : vector<16x128xf32>
      %c0_22 = arith.constant 0 : index
      %c0_23 = arith.constant 0 : index
      %29 = vector.load %arg7[%c0_22, %c0_23] : memref<16x128xf32, #tpu.memory_space<vmem>>, vector<16x128xf32>
      tpu.vector_store %arg7[%c0_22, %c0_23], %28 {strides = array<i32>} : memref<16x128xf32, #tpu.memory_space<vmem>>, vector<16x128xf32>,
    } else {
    }
    return
  }
  func.func @transform_0(%arg0: i32, %arg1: i32) -> (i32, i32) {
    %c0_i32 = arith.constant 0 : i32
    %c0_i32_0 = arith.constant 0 : i32
    return %arg0, %c0_i32 : i32, i32
  }
  func.func @transform_1(%arg0: i32, %arg1: i32) -> (i32, i32) {
    %c0_i32 = arith.constant 0 : i32
    %c0_i32_0 = arith.constant 0 : i32
    return %c0_i32, %arg1 : i32, i32
  }
  func.func @transform_2(%arg0: i32, %arg1: i32) -> (i32, i32) {
    %c0_i32 = arith.constant 0 : i32
    %c0_i32_0 = arith.constant 0 : i32
    return %c0_i32, %arg1 : i32, i32
  }
  func.func @transform_3(%arg0: i32, %arg1: i32) -> (i32, i32) {
    %c0_i32 = arith.constant 0 : i32
    %c0_i32_0 = arith.constant 0 : i32
    return %arg1, %c0_i32 : i32, i32
  }
  func.func @transform_4(%arg0: i32, %arg1: i32) -> (i32, i32) {
    %c0_i32 = arith.constant 0 : i32
    %c0_i32_0 = arith.constant 0 : i32
    %c0_i32_1 = arith.constant 0 : i32
    return %c0_i32, %c0_i32_0 : i32, i32
  }
  func.func @transform_5(%arg0: i32, %arg1: i32) -> (i32, i32) {
    %c0_i32 = arith.constant 0 : i32
    %c0_i32_0 = arith.constant 0 : i32
    return %arg0, %c0_i32 : i32, i32
  }
}

</mosaic_0001>

<bundles_post_ra>
// kernel: tpu_custom_call.1
= control target key start
LH: loop header
LB: loop body
LE: loop exit
PB: predicated region body
PF: predicated region fallthrough
CT: control target
= control target key end

     0   :  { %10 = vsyncpa [#allocation4], 0  ;;  %s507_s0 = inlined_call_operand.hbm [shape: f32[16,32], index: 0, kind: input, shape index: {}]   ;;  %s508_s1 = inlined_call_operand.hbm [shape: f32[32,64], index: 1, kind: input, shape index: {}]   ;;  %s509_s2 = inlined_call_operand.vmem [shape: f32[1,64], index: 2, kind: input, shape index: {}]   ;;  %s510_s3 = inlined_call_operand.hbm [shape: f32[64,128], index: 3, kind: input, shape index: {}]   ;;  %s511_s4 = inlined_call_operand.vmem [shape: f32[1,128], index: 4, kind: input, shape index: {}]   ;;  %s512_s5 = inlined_call_operand.hbm [shape: f32[16,128], index: 5, kind: output, shape index: {}]  }
   0x1   :  { %11 = vsyncpa [#allocation7], 0 }
   0x2   :  { %12 = vsyncpa [#allocation5], 0  ;;  %s30_s20 = sshll.u32 %s508_s1, 4  ;;  %s411_s21 = smov [#allocation6]   ;;  %s31_s20 = int_to_ptr.hbm [resolvable:$true] %s30_s20 }
   0x3   :  { %s32_s22 = sshll.u32 %s411_s21, 4  ;;  %s17_s25 = sshll.u32 %s507_s0, 4  ;;  %s33_s22 = int_to_ptr.vmem [resolvable:$true] %s32_s22  ;;  %s18_s25 = int_to_ptr.hbm [resolvable:$true] %s17_s25 }
   0x4   :  { %s412_s26 = smov 128   ;;  %s413_s27 = smov 8  }
   0x5   :  { %38 = dma.hbm_to_vmem [thread:$0]  %s31_s20, 512, %s33_s22, [#allocation7], %s412_s26, %s412_s26, %s413_s27  }
   0x6   :  { %s414_s28 = smov [#allocation3]   ;;  %s45_s1 = sshll.u32 %s510_s3, 4  ;;  %s46_s1 = int_to_ptr.hbm [resolvable:$true] %s45_s1 }
   0x7   :  { %s19_s29 = sshll.u32 %s414_s28, 4  ;;  %s415_s0 = smov [#allocation8]   ;;  %s20_s29 = int_to_ptr.vmem [resolvable:$true] %s19_s29 }
   0x8   :  { %25 = dma.hbm_to_vmem [thread:$0]  %s18_s25, 256, %s20_s29, [#allocation4], %s412_s26, %s412_s26, %s413_s27  }
   0x9   :  { %s47_s7 = sshll.u32 %s415_s0, 4  ;;  %s48_s7 = int_to_ptr.vmem [resolvable:$true] %s47_s7 }
   0xa   :  { %53 = dma.hbm_to_vmem [thread:$0]  %s46_s1, 1024, %s48_s7, [#allocation7], %s412_s26, %s412_s26, %s413_s27  }
   0xb   :  { %405 = dma.done.wait [#allocation4], 256  }
   0xc   :  { %406 = vsyncadd [#allocation4], 4294967040 }
   0xd   :  { %407 = dma.done.wait [#allocation7], 1536  }
   0xe   :  { %408 = vsyncadd [#allocation7], 4294965760  ;;  %v79_v0 = vld [vmem:[#allocation6 + $0x18] sm:$0xff]  ;;  %v78_v1 = vld [vmem:[#allocation6 + $0x10] sm:$0xff]  ;;  %vm84_vm0 = vcmask 261120   ;;  %vm212_vm9 = vcmask 523264  }
   0xf   :  { %103 = vmatpush.msra.mxu0 %v79_v0  ;;  %285 = vmatpush.msra.mxu3 %v79_v0  ;;  %v77_v2 = vld [vmem:[#allocation6 + $0x8] sm:$0xff]  ;;  %v76_v3 = vld [vmem:[#allocation6] sm:$0xff]  ;;  %v74_v4 = vld [vmem:[#allocation3] sm:$0xff]  ;;  %s416_s10 = smov [#allocation9]   ;;  %s265_s14 = sshll.u32 %s512_s5, 4  ;;  %s266_s14 = int_to_ptr.hbm [resolvable:$true] %s265_s14 }
  0x10   :  { %v75_v5 = vld [vmem:[#allocation3 + $0x8] sm:$0xff]  ;;  %v303_v6 = vld [vmem:[%s509_s2] ss:$0 sm:$0xff]  ;;  %v209_v22 = vld [vmem:[#allocation8 + $0x28] sm:$0xff]  ;;  %s263_s11 = sshll.u32 %s416_s10, 4  ;;  %s264_s11 = int_to_ptr.vmem [resolvable:$true] %s263_s11 }
  0x11   :  { %104 = vmatpush.msra.mxu0 %v78_v1  ;;  %286 = vmatpush.msra.mxu3 %v78_v1  ;;  %v211_v14 = vld [vmem:[#allocation8 + $0x38] sm:$0xff]  ;;  %v210_v18 = vld [vmem:[#allocation8 + $0x30] sm:$0xff]  ;;  %v208_v26 = vld [vmem:[#allocation8 + $0x20] sm:$0xff] }
  0x12   :  { %227 = vmatpush.msra.mxu1 %v211_v14  ;;  %289 = vmatpush.msra.mxu2 %v211_v14  ;;  %v207_v31 = vld [vmem:[#allocation8 + $0x18] sm:$0xff]  ;;  %v206_v35 = vld [vmem:[#allocation8 + $0x10] sm:$0xff]  ;;  %v205_v40 = vld [vmem:[#allocation8 + $0x8] sm:$0xff] }
  0x13   :  { %105 = vmatpush.msra.mxu0 %v77_v2  ;;  %287 = vmatpush.msra.mxu3 %v77_v2  ;;  %v204_v42 = vld [vmem:[#allocation8] sm:$0xff] }
  0x14   :  { %228 = vmatpush.msra.mxu1 %v210_v18  ;;  %290 = vmatpush.msra.mxu2 %v210_v18 }
  0x15   :  { %106 = vmatpush.msra.mxu0 %v76_v3  ;;  %288 = vmatpush.msra.mxu3 %v76_v3 }
  0x16   :  { %279 = vmatmul.msk.f32.vlgmr.msra.gmra.mxu0 %vm84_vm0, %v74_v4  ;;  %280 = vmatmul.msk.f32.vlgmr.msra.gmra.mxu3 %vm84_vm0, %v75_v5 }
  0x17   :  { %229 = vmatpush.msra.mxu1 %v209_v22  ;;  %291 = vmatpush.msra.mxu2 %v209_v22 }
  0x19   :  { %230 = vmatpush.msra.mxu1 %v208_v26  ;;  %292 = vmatpush.msra.mxu2 %v208_v26 }
  0x1b   :  { %231 = vmatpush.msra.mxu1 %v207_v31  ;;  %293 = vmatpush.msra.mxu2 %v207_v31 }
  0x1d   :  { %232 = vmatpush.msra.mxu1 %v206_v35  ;;  %294 = vmatpush.msra.mxu2 %v206_v35 }
  0x1f   :  { %233 = vmatpush.msra.mxu1 %v205_v40  ;;  %295 = vmatpush.msra.mxu2 %v205_v40 }
  0x21   :  { %234 = vmatpush.msra.mxu1 %v204_v42  ;;  %296 = vmatpush.msra.mxu2 %v204_v42 }
  0x93   :  { %v108_v7 = vpop.f32.mrf.mxu0 }
  0x94   :  { %v468_v8 = vadd.f32 %v303_v6, %v108_v7 }
  0x96   :  { %v471_v9 = vmul.f32 0.70710677, %v468_v8  ;;  %v114_v26 = vmul.f32 0.5, %v468_v8  ;;  %v304_v8 = vld [vmem:[%s511_s4] ss:$0 sm:$0xff] }
  0x98   :  { %v118_v10 = vmul.f32 %v471_v9, %v471_v9 }
  0x99   :  { %v111_v11 = vpop.f32.mrf.mxu3 }
  0x9a   :  { %v475_v12 = vmin.f32 %v118_v10, 16.0  ;;  %v477_v13 = vadd.f32 %v303_v6, %v111_v11 }
  0x9c   :  { %v120_v15 = vmul.f32 2.1237322e-06, %v475_v12  ;;  %v131_v16 = vmul.f32 3.8918573e-05, %v475_v12  ;;  %v482_v17 = vmul.f32 0.70710677, %v477_v13 }
  0x9e   :  { %v121_v19 = vadd.f32 0.00028619796, %v120_v15  ;;  %v132_v20 = vadd.f32 0.001143296, %v131_v16  ;;  %v158_v21 = vmul.f32 %v482_v17, %v482_v17 }
  0xa0   :  { %v122_v23 = vmul.f32 %v121_v19, %v475_v12  ;;  %v133_v24 = vmul.f32 %v132_v20, %v475_v12  ;;  %v159_v25 = vmin.f32 %v158_v21, 16.0 }
  0xa2   :  { %v123_v27 = vadd.f32 0.0036580483, %v122_v23  ;;  %v134_v28 = vadd.f32 0.014752088, %v133_v24  ;;  %v160_v29 = vmul.f32 2.1237322e-06, %v159_v25 }
  0xa3   :  { %v171_v30 = vmul.f32 3.8918573e-05, %v159_v25 }
  0xa4   :  { %v135_v32 = vmul.f32 %v134_v28, %v475_v12  ;;  %v161_v33 = vadd.f32 0.00028619796, %v160_v29  ;;  %v124_v37 = vmul.f32 %v123_v27, %v475_v12 }
  0xa5   :  { %v172_v34 = vadd.f32 0.001143296, %v171_v30 }
  0xa6   :  { %v136_v36 = vadd.f32 0.112945676, %v135_v32  ;;  %v162_v38 = vmul.f32 %v161_v33, %v159_v25  ;;  %v125_v46 = vadd.f32 0.05243302, %v124_v37  ;;  %v115_v33 = vmul.f32 0.5, %v477_v13 }
  0xa7   :  { %v173_v39 = vmul.f32 %v172_v34, %v159_v25 }
  0xa8   :  { %v137_v41 = vmul.f32 %v136_v36, %v475_v12  ;;  %v163_v45 = vadd.f32 0.0036580483, %v162_v38  ;;  %v126_v52 = vmul.f32 %v125_v46, %v475_v12 }
  0xa9   :  { %v174_v43 = vadd.f32 0.014752088, %v173_v39 }
  0xaa   :  { %v138_v44 = vadd.f32 0.4994258, %v137_v41  ;;  %v164_v51 = vmul.f32 %v163_v45, %v159_v25  ;;  %v127_v56 = vadd.f32 0.18741608, %v126_v52 }
  0xab   :  { %v175_v47 = vmul.f32 %v174_v43, %v159_v25 }
  0xac   :  { %v139_v48 = vmul.f32 %v138_v44, %v475_v12  ;;  %v165_v55 = vadd.f32 0.05243302, %v164_v51  ;;  %v128_v61 = vmul.f32 %v127_v56, %v475_v12 }
  0xad   :  { %v176_v49 = vadd.f32 0.112945676, %v175_v47 }
  0xae   :  { %v140_v50 = vadd.f32 1.0, %v139_v48  ;;  %v166_v60 = vmul.f32 %v165_v55, %v159_v25  ;;  %v129_v2 = vadd.f32 1.1283791, %v128_v61 }
  0xaf   :  { %v177_v53 = vmul.f32 %v176_v49, %v159_v25 }
  0xb0   :  { %305 = vrcp.f32 %v140_v50  ;;  %v152_v0 = vand.u32 2147483648, %v140_v50  ;;  %v167_v1 = vadd.f32 0.18741608, %v166_v60  ;;  %v150_v4 = vand.u32 2147483647, %v140_v50 }
  0xb1   :  { %v178_v54 = vadd.f32 0.4994258, %v177_v53  ;;  %vm146_vm2 = vweird.f32 %v140_v50  ;;  %v130_v14 = vmul.f32 %v129_v2, %v471_v9 }
  0xb2   :  { %v153_v7 = vor.u32 1.1754944e-38, %v152_v0  ;;  %v168_v10 = vmul.f32 %v167_v1, %v159_v25  ;;  %vm151_vm4 = vcmp.eq.f32.partialorder %v150_v4, 8.507059e+37 }
  0xb3   :  { %v179_v57 = vmul.f32 %v178_v54, %v159_v25 }
  0xb4   :  { %v169_v20 = vadd.f32 1.1283791, %v168_v10 }
  0xb5   :  { %v180_v58 = vadd.f32 1.0, %v179_v57 }
  0xb6   :  { %v306_v59 = vpop.eup %305  ;;  %v170_v9 = vmul.f32 %v169_v20, %v482_v17 }
  0xb7   :  { %v142_v62 = vmul.f32 %v306_v59, %v140_v50  ;;  %307 = vrcp.f32 %v180_v58  ;;  %vm147_vm1 = vweird.f32 %v306_v59  ;;  %v192_v19 = vand.u32 2147483648, %v180_v58 }
  0xb8   :  { %vm148_vm3 = vmor %vm146_vm2, %vm147_vm1  ;;  %v190_v22 = vand.u32 2147483647, %v180_v58  ;;  %vm186_vm6 = vweird.f32 %v180_v58 }
  0xb9   :  { %v143_v63 = vsub.f32 1.0, %v142_v62  ;;  %v193_v25 = vor.u32 1.1754944e-38, %v192_v19 }
  0xba   :  { %vm191_vm8 = vcmp.eq.f32.partialorder %v190_v22, 8.507059e+37 }
  0xbb   :  { %v144_v3 = vmul.f32 %v306_v59, %v143_v63 }
  0xbd   :  { %v308_v5 = vpop.eup %307  ;;  %v145_v6 = vadd.f32 %v306_v59, %v144_v3 }
  0xbe   :  { %v182_v11 = vmul.f32 %v308_v5, %v180_v58  ;;  %vm187_vm5 = vweird.f32 %v308_v5 }
  0xbf   :  { %v149_v15 = vsel %vm148_vm3, %v306_v59, %v145_v6  ;;  %vm188_vm7 = vmor %vm186_vm6, %vm187_vm5 }
  0xc0   :  { %v154_v12 = vsel %vm151_vm4, %v153_v7, %v149_v15  ;;  %v183_v16 = vsub.f32 1.0, %v182_v11 }
  0xc1   :  { %v155_v18 = vmul.f32 %v154_v12, %v130_v14 }
  0xc2   :  { %v184_v21 = vmul.f32 %v308_v5, %v183_v16 }
  0xc3   :  { %v281_v23 = vclamps-f32 %v155_v18, 1.0 }
  0xc4   :  { %v185_v24 = vadd.f32 %v308_v5, %v184_v21 }
  0xc5   :  { %v198_v27 = vadd.f32 1.0, %v281_v23 }
  0xc6   :  { %v189_v28 = vsel %vm188_vm7, %v308_v5, %v185_v24 }
  0xc7   :  { %v194_v29 = vsel %vm191_vm8, %v193_v25, %v189_v28  ;;  %v200_v30 = vmul.f32 %v198_v27, %v114_v26 }
  0xc8   :  { %v195_v31 = vmul.f32 %v194_v29, %v170_v9 }
  0xc9   :  { %283 = vmatmul.msk.f32.vlgmr.msra.gmra.mxu1 %vm212_vm9, %v200_v30 }
  0xca   :  { %v282_v32 = vclamps-f32 %v195_v31, 1.0 }
  0xcc   :  { %v199_v34 = vadd.f32 1.0, %v282_v32 }
  0xce   :  { %v201_v35 = vmul.f32 %v199_v34, %v115_v33 }
  0xd0   :  { %284 = vmatmul.msk.f32.vlgmr.msra.gmra.mxu2 %vm212_vm9, %v201_v35 }
 0x146   :  { %v236_v36 = vpop.f32.mrf.mxu1 }
 0x147   :  { %v255_v37 = vadd.f32 %v304_v8, %v236_v36 }
 0x149   :  { %257 = vst [vmem:[#allocation9] sm:$0xff] %v255_v37 }
 0x153   :  { %v239_v17 = vpop.f32.mrf.mxu2 }
 0x154   :  { %v256_v38 = vadd.f32 %v304_v8, %v239_v17 }
 0x156   :  { %258 = vst [vmem:[#allocation9 + $0x8] sm:$0xff] %v256_v38 }
 0x157   :  { %271 = dma.vmem_to_hbm [thread:$0]  %s264_s11, 256, %s266_s14, [#allocation5], %s412_s26, %s412_s26, %s413_s27  }
 0x158   :  { %409 = dma.done.wait [#allocation5], 256  }
 0x159   :  { %410 = vsyncadd [#allocation5], 4294967040 }
 0x15a   :  { %276 = vsyncpa [#allocation4], 1 }
 0x15b   :  { %277 = vsyncpa [#allocation7], 1 }
 0x15c   :  { %278 = vsyncpa [#allocation5], 1 }

</bundles_post_ra>
